<compile_context>
chip_gen: v6e
topology: v6e:2x2x1
jax: 0.10.0
libtpu: 0.0.40
codegen_flags: <defaults>
</compile_context>

<pallas_src>
import functools
import math

import jax
import jax.numpy as jnp
from jax.experimental import pallas as pl
from jax.experimental.pallas import tpu as pltpu


# ---------------------------------------------------------------------------
# Pallas kernel: per-row sum of squared error, streamed over lane tiles.
# Grid = (row_blocks ["parallel"], lane_tiles ["arbitrary"]).
# ---------------------------------------------------------------------------
def _mse_sse_kernel(x_ref, y_ref, out_ref, acc_ref, *,
                    tn, m_valid, group_width, needs_mask):
    k = pl.program_id(1)

    @pl.when(k == 0)
    def _init():
        acc_ref[...] = jnp.zeros_like(acc_ref)

    rows = x_ref.shape[0]

    if group_width is not None:
        # Lane-dense accumulation: reduce `group_width`-lane groups with plain
        # VALU adds; intermediates stay register-sized regardless of tile size.
        gw = group_width
        if needs_mask:
            # Absolute lane index of each element in this tile (hoisted).
            base = jax.lax.broadcasted_iota(jnp.int32, (rows, gw), 1) + k * tn
        s = jnp.zeros((rows, gw), jnp.float32)
        for g in range(tn // gw):
            lo = g * gw
            dg = (x_ref[:, lo:lo + gw].astype(jnp.float32)
                  - y_ref[:, lo:lo + gw].astype(jnp.float32))
            d2 = dg * dg
            if needs_mask:
                # Zero out-of-range lanes of the (partial) last lane tile.
                d2 = jnp.where((base + lo) < m_valid, d2, 0.0)
            s = s + d2
        acc_ref[...] += s
    else:
        # Single full-width block whose lane count is not a multiple of 128
        # (block spans the full row, so no masking is ever needed here).
        d = x_ref[...].astype(jnp.float32) - y_ref[...].astype(jnp.float32)
        acc_ref[...] += jnp.sum(d * d, axis=1, keepdims=True)

    @pl.when(k == pl.num_programs(1) - 1)
    def _finalize():
        # One cross-lane (XLU) reduce per row block, only on the last step.
        out_ref[...] = jnp.sum(acc_ref[...], axis=1, keepdims=True)


# ---------------------------------------------------------------------------
# Wrapper (equivalent of MSELoss.forward)
# ---------------------------------------------------------------------------
def _pick_rows_per_batch(n, itemsize):
    # Sublane packing target: 8 for f32, 16 for bf16, 32 for int8/fp8.
    r = 8 * max(1, 4 // int(itemsize))
    while r > 1 and n % r != 0:
        r //= 2
    return max(r, 1)


def mse_loss(i_fm1, i_fm2, *,
             target_block_bytes=4 * 1024 * 1024,
             max_lane_tile=131072):
    assert i_fm1.shape == i_fm2.shape, "MSELoss expects same-shape inputs"
    b = i_fm1.shape[0]
    n = int(math.prod(i_fm1.shape[1:]))          # elements per batch
    itemsize = jnp.dtype(i_fm1.dtype).itemsize

    # Free views only (no pad, no copies): (B, ...) -> (B*R, N/R).
    r = _pick_rows_per_batch(n, itemsize)
    m = n // r
    br = b * r
    x = i_fm1.reshape(br, m)
    y = i_fm2.reshape(br, m)

    # Split rows across v7x's two TensorCores when layout allows
    # (each half must stay a multiple of 8 sublanes). Harmless on v5e/v6e.
    if br % 16 == 0:
        n_row_blocks, row_blk = 2, br // 2
    else:
        n_row_blocks, row_blk = 1, br

    # Lane tile: as big as the pipeline budget allows (2 inputs x 2 buffers),
    # multiple of 128; small inputs get one full-width step.
    tn_cap = (target_block_bytes // max(1, row_blk * itemsize)) // 128 * 128
    tn_cap = int(min(max_lane_tile, max(128, tn_cap)))
    if m <= tn_cap:
        tn, grid_k, needs_mask = m, 1, False
    else:
        tn = tn_cap
        grid_k = -(-m // tn)
        needs_mask = (m % tn) != 0

    if tn % 128 == 0:
        group_width = 128
        for cand in (2048, 1024, 512, 256):
            if tn % cand == 0:
                group_width = cand
                break
        acc_lanes = group_width
    else:
        group_width = None
        acc_lanes = 1

    block_bytes = row_blk * tn * itemsize
    # 2 inputs x double buffer + scratch/headroom; > v5e's 16 MiB default,
    # comfortably below v7x's 64 MiB physical VMEM.
    vmem_limit = int(min(64 * 1024 * 1024, max(32 * 1024 * 1024, 5 * block_bytes)))

    kernel = functools.partial(
        _mse_sse_kernel, tn=tn, m_valid=m,
        group_width=group_width, needs_mask=needs_mask)

    sse_rows = pl.pallas_call(
        kernel,
        out_shape=jax.ShapeDtypeStruct((br, 1), jnp.float32),
        grid_spec=pltpu.PrefetchScalarGridSpec(
            num_scalar_prefetch=0,
            grid=(n_row_blocks, grid_k),
            in_specs=[
                pl.BlockSpec((row_blk, tn), lambda ri, k: (ri, k)),   # fm1
                pl.BlockSpec((row_blk, tn), lambda ri, k: (ri, k)),   # fm2
            ],
            out_specs=pl.BlockSpec((row_blk, 1), lambda ri, k: (ri, 0)),
            scratch_shapes=[pltpu.VMEM((row_blk, acc_lanes), jnp.float32)],
        ),
        compiler_params=pltpu.CompilerParams(
            dimension_semantics=("parallel", "arbitrary"),
            vmem_limit_bytes=vmem_limit,
        ),
    )(x, y)

    # Tiny fused epilogue on b*r scalars: per-batch combine + mean normalize.
    sse = jnp.sum(sse_rows.reshape(b, r), axis=1)
    return (sse * (1.0 / float(n))).astype(i_fm1.dtype)


# ---------------------------------------------------------------------------
if __name__ == "__main__":
    key = jax.random.PRNGKey(0)
    k1, k2, k3, k4 = jax.random.split(key, 4)

    # Primary case: (B, C, H, W) feature maps.
    b, c, h, w = 2, 4, 16, 16
    fm1 = jax.random.normal(k1, (b, c, h, w), dtype=jnp.float32)
    fm2 = jax.random.normal(k2, (b, c, h, w), dtype=jnp.float32)

    loss = jax.block_until_ready(mse_loss(fm1, fm2))
    assert loss.shape == (b,)
    ref = jnp.sum(((fm1 - fm2) ** 2).reshape(b, -1), axis=1) / float(c * h * w)
    assert bool(jnp.all(jnp.isfinite(loss)))
    assert jnp.allclose(loss, ref, rtol=1e-5, atol=1e-6), (loss, ref)

    # Ragged / multi-step reduction path: force a small lane tile so the last
    # lane block is partial and exercises the in-kernel tail mask (no host pad).
    g1 = jax.random.normal(k3, (2, 4, 16, 18), dtype=jnp.float32)
    g2 = jax.random.normal(k4, (2, 4, 16, 18), dtype=jnp.float32)
    loss2 = jax.block_until_ready(mse_loss(g1, g2, max_lane_tile=128))
    ref2 = jnp.sum(((g1 - g2) ** 2).reshape(2, -1), axis=1) / float(4 * 16 * 18)
    assert jnp.allclose(loss2, ref2, rtol=1e-5, atol=1e-6), (loss2, ref2)

    print("KERNEL_OK")
</pallas_src>

<mosaic_0001>
module attributes {stable_mosaic.version = 11 : i64} {
  func.func @_mse_sse_kernel(%arg0: i32, %arg1: i32, %arg2: memref<8x128xf32, #tpu.memory_space<vmem>>, %arg3: memref<8x128xf32, #tpu.memory_space<vmem>>, %arg4: memref<8x1xf32, #tpu.memory_space<vmem>>, %arg5: memref<8x128xf32, #tpu.memory_space<vmem>>) attributes {dimension_semantics = [#tpu.dimension_semantics<parallel>, #tpu.dimension_semantics<arbitrary>], iteration_bounds = array<i64: 2, 1>, scalar_prefetch = 0 : i64, scratch_operands = 1 : i64, tpu.core_type = #tpu.core_type<tc>, window_params = [{transform_indices = @transform_0, window_bounds = array<i64: 8, 128>}, {transform_indices = @transform_1, window_bounds = array<i64: 8, 128>}, {transform_indices = @transform_2, window_bounds = array<i64: 8, 1>}]} {
    %c0_i32 = arith.constant 0 : i32
    %0 = arith.cmpi eq, %arg1, %c0_i32 : i32
    %1 = arith.extui %0 : i1 to i32
    %c0_i32_0 = arith.constant 0 : i32
    %2 = arith.cmpi ne, %1, %c0_i32_0 : i32
    scf.if %2 {
      %cst_10 = arith.constant 0.000000e+00 : f32
      %15 = vector.broadcast %cst_10 : f32 to vector<8x128xf32>
      %c0_11 = arith.constant 0 : index
      %c0_12 = arith.constant 0 : index
      %16 = vector.load %arg5[%c0_11, %c0_12] : memref<8x128xf32, #tpu.memory_space<vmem>>, vector<8x128xf32>
      tpu.vector_store %arg5[%c0_11, %c0_12], %15 {strides = array<i32>} : memref<8x128xf32, #tpu.memory_space<vmem>>, vector<8x128xf32>,
    } else {
    }
    %cst = arith.constant 0.000000e+00 : f32
    %3 = vector.broadcast %cst : f32 to vector<8x128xf32>
    %c0 = arith.constant 0 : index
    %c0_1 = arith.constant 0 : index
    %4 = vector.load %arg2[%c0, %c0_1] : memref<8x128xf32, #tpu.memory_space<vmem>>, vector<8x128xf32>
    %c0_2 = arith.constant 0 : index
    %c0_3 = arith.constant 0 : index
    %5 = vector.load %arg3[%c0_2, %c0_3] : memref<8x128xf32, #tpu.memory_space<vmem>>, vector<8x128xf32>
    %6 = arith.subf %4, %5 : vector<8x128xf32>
    %7 = arith.mulf %6, %6 : vector<8x128xf32>
    %8 = arith.addf %3, %7 : vector<8x128xf32>
    %c0_4 = arith.constant 0 : index
    %c0_5 = arith.constant 0 : index
    %9 = vector.load %arg5[%c0_4, %c0_5] : memref<8x128xf32, #tpu.memory_space<vmem>>, vector<8x128xf32>
    %10 = arith.addf %9, %8 : vector<8x128xf32>
    %c0_6 = arith.constant 0 : index
    %c0_7 = arith.constant 0 : index
    %11 = vector.load %arg5[%c0_6, %c0_7] : memref<8x128xf32, #tpu.memory_space<vmem>>, vector<8x128xf32>
    tpu.vector_store %arg5[%c0_6, %c0_7], %10 {strides = array<i32>} : memref<8x128xf32, #tpu.memory_space<vmem>>, vector<8x128xf32>,
    %c0_i32_8 = arith.constant 0 : i32
    %12 = arith.cmpi eq, %arg1, %c0_i32_8 : i32
    %13 = arith.extui %12 : i1 to i32
    %c0_i32_9 = arith.constant 0 : i32
    %14 = arith.cmpi ne, %13, %c0_i32_9 : i32
    scf.if %14 {
      %c0_10 = arith.constant 0 : index
      %c0_11 = arith.constant 0 : index
      %15 = vector.load %arg5[%c0_10, %c0_11] : memref<8x128xf32, #tpu.memory_space<vmem>>, vector<8x128xf32>
      %cst_12 = arith.constant dense<0.000000e+00> : vector<8xf32>
      %16 = vector.multi_reduction <add>, %15, %cst_12 [1] : vector<8x128xf32> to vector<8xf32>
      %17 = vector.shape_cast %16 : vector<8xf32> to vector<8x1xf32>
      %c0_13 = arith.constant 0 : index
      %c0_14 = arith.constant 0 : index
      %18 = vector.load %arg4[%c0_13, %c0_14] : memref<8x1xf32, #tpu.memory_space<vmem>>, vector<8x1xf32>
      tpu.vector_store %arg4[%c0_13, %c0_14], %17 {strides = array<i32>} : memref<8x1xf32, #tpu.memory_space<vmem>>, vector<8x1xf32>,
    } else {
    }
    return
  }
  func.func @transform_0(%arg0: i32, %arg1: i32) -> (i32, i32) {
    %c0_i32 = arith.constant 0 : i32
    return %arg0, %arg1 : i32, i32
  }
  func.func @transform_1(%arg0: i32, %arg1: i32) -> (i32, i32) {
    %c0_i32 = arith.constant 0 : i32
    return %arg0, %arg1 : i32, i32
  }
  func.func @transform_2(%arg0: i32, %arg1: i32) -> (i32, i32) {
    %c0_i32 = arith.constant 0 : i32
    %c0_i32_0 = arith.constant 0 : i32
    return %arg0, %c0_i32 : i32, i32
  }
}

</mosaic_0001>

<bundles_post_ra>
// kernel: tpu_custom_call.1
= control target key start
LH: loop header
LB: loop body
LE: loop exit
PB: predicated region body
PF: predicated region fallthrough
CT: control target
= control target key end

     0   :  { %7 = vsyncpa [#allocation4], 0  ;;  %s662_s0 = inlined_call_operand.hbm [shape: f32[16,128], index: 0, kind: input, shape index: {}]   ;;  %s663_s1 = inlined_call_operand.hbm [shape: f32[16,128], index: 1, kind: input, shape index: {}]   ;;  %s664_s2 = inlined_call_operand.vmem [shape: f32[16,1], index: 2, kind: output, shape index: {}]  }
   0x1   :  { %9 = vsyncpa [#allocation4 + $0x1], 0 }
   0x2   :  { %10 = vsyncpa [#allocation6], 0 }
   0x3   :  { %12 = vsyncpa [#allocation6 + $0x1], 0  ;;  %s536_s9 = smov 0   ;;  %s538_s10 = smov 0  }
   0x4   :  { %s540_s11 = smov 0   ;;  %s542_s12 = smov 0  }
   0x5   :  { %s544_s13 = smov 0   ;;  %s546_s14 = smov 0  }
   0x6 LB: > { %s333_s15 = sadd.s32 4294967295, %s517_s14   ;;  %s30_s16 = sadd.s32 1, %s513_s13  ;;  %s517_s14 = sphi %s546_s14, %s18_s14   ;;  %s513_s13 = sphi %s544_s13, %s673_s13   ;;  %s509_s12 = sphi %s542_s12, %s672_s12   ;;  %s505_s11 = sphi %s540_s11, %s671_s11   ;;  %s501_s10 = sphi %s538_s10, %s670_s10   ;;  %s497_s9 = sphi %s536_s9, %s669_s9  }
   0x7   : > { %p32_p0 = scmp.ge.s32.totalorder %s30_s16, 2  ;;  %s39_s17 = sadd.s32 1, %s505_s11 }
   0x8   : > { %p46_p1 = scmp.ne.s32.totalorder %s505_s11, %s501_s10  ;;  %p47_p2 = scmp.eq.s32.totalorder %s517_s14, 0 }
   0x9   : > { %s675_s16 = smov (%p32_p0, %s30_s16), 0  ;;  %p52_p4 = scmp.ne.s32.totalorder %s501_s10, %s497_s9 }
   0xa   : > { %p572_p3 = por %p47_p2, %p46_p1  ;;  %s34_s19 = ssub.s32 %s513_s13, %s675_s16 }
   0xb   : > { %p53_p5 = scmp.eq.s32.totalorder %s333_s15, 0  ;;  %p37_p6 = scmp.eq.s32.totalorder %s34_s19, 0 }
   0xc   : > { %p358_p8 = scmp.lt.s32.totalorder %s517_s14, 2  ;;  %s588_s22 = sand.u32 1, %s505_s11  }
   0xd   : > { %p579_p7 = por %p53_p5, %p52_p4  ;;  %s338_s23 = sshll.u32 %s513_s13, 7 }
   0xe   : > { %s585_s21 = scalar_select %p37_p6, %s505_s11, %s39_s17  }
   0xf   : > { %s337_s24 = sshll.u32 %s588_s22, 3  ;;  %s140_s27 = scalar_lea.hbm %s662_s0, %s338_s23 }
  0x10   : > { %s134_s28 = scalar_lea.vmem [#allocation3], %s337_s24  ;;  %p597_p9 = pnand %p358_p8, %p572_p3 }
  0x11   : > { %s142_s29 = sshll.u32 %s134_s28, 4  ;;  %p341_p10 = scmp.ge.s32.totalorder %s517_s14, 1  ;;  %s143_s29 = int_to_ptr.vmem [resolvable:$true] %s142_s29 }
  0x12   : > { %p166_p11 = scmp.lt.s32.totalorder %s517_s14, 3  ;;  %s131_s3 = scalar_lea.sflag [#allocation4], %s588_s22 }
  0x13   : > { %p409_p12 = pneg %p597_p9  ;;  %s420_s4 = scalar_lea.vmem %s143_s29, 128 }
  0x14   : > { %p421_p13 = scmp.ne.s32.totalorder %s143_s29, %s420_s4  ;;  %s519_s5 = smov [#allocation3]  }
  0x15   : > { %s425_s6 = sshll.u32 %s519_s5, 4  ;;  %s426_s6 = int_to_ptr.vmem [resolvable:$false] %s425_s6 }
  0x16   : > { %p423_p0 = pnand %p421_p13, %p409_p12  ;;  %s427_s7 = scalar_lea.vmem %s426_s6, 256 }
  0x17   : > { %p428_p2 = scmp.lt.s32.totalorder %s143_s29, %s426_s6  ;;  %p429_p3 = scmp.lt.s32.totalorder %s427_s7, %s420_s4 }
  0x18   : > { %p424_p1 = pneg %p423_p0 }
  0x19   : > { %p430_p4 = por %p429_p3, %p428_p2 }
  0x1b   : > { %p431_p5 = pnand %p430_p4, %p424_p1 }
  0x1d   : > { %434 = shalt.err (!%p431_p5)
}
  0x1e   : > { %354 = dma.hbm_to_vmem [thread:$0]  (!%p597_p9), %s140_s27, 128, %s143_s29, %s131_s3  }
  0x1f   : > { %p615_p6 = pnand %p341_p10, %p166_p11  ;;  %s159_s17 = scalar_lea.hbm %s663_s1, %s338_s23 }
  0x20   : > { %s153_s18 = scalar_lea.vmem [#allocation5], %s337_s24  ;;  %s150_s25 = scalar_lea.sflag [#allocation6], %s588_s22 }
  0x21   : > { %s161_s19 = sshll.u32 %s153_s18, 4  ;;  %s520_s27 = smov [#allocation5]   ;;  %s162_s19 = int_to_ptr.vmem [resolvable:$true] %s161_s19 }
  0x22   : > { %s448_s26 = scalar_lea.vmem %s162_s19, 128  ;;  %s453_s28 = sshll.u32 %s520_s27, 4  ;;  %s454_s28 = int_to_ptr.vmem [resolvable:$false] %s453_s28 }
  0x23   : > { %p449_p8 = scmp.ne.s32.totalorder %s162_s19, %s448_s26  ;;  %s455_s29 = scalar_lea.vmem %s454_s28, 256 }
  0x24   : > { %p456_p10 = scmp.lt.s32.totalorder %s162_s19, %s454_s28  ;;  %p457_p11 = scmp.lt.s32.totalorder %s455_s29, %s448_s26 }
  0x25   : > { %p451_p13 = pnand %p449_p8, %p409_p12 }
  0x26   : > { %p458_p1 = por %p457_p11, %p456_p10 }
  0x27   : > { %p452_p0 = pneg %p451_p13 }
  0x29   : > { %p459_p2 = pnand %p458_p1, %p452_p0 }
  0x2b   : > { %462 = shalt.err (!%p459_p2)
}
  0x2c   : > { %357 = dma.hbm_to_vmem [thread:$0]  (!%p597_p9), %s159_s17, 128, %s162_s19, %s150_s25  }
  0x2d   : > { %170 = sbr.rel (%p615_p6) target bundleno = 197 (0xc5), region = 28  ;;  %s172_s22 = sand.u32 (!%p615_p6), 1, %s501_s10  }
  0x2e   : > { %s342_s23 = sshll.u32 (!%p615_p6), %s172_s22, 3  ;;  %s173_s24 = scalar_lea.sflag (!%p615_p6), [#allocation4], %s172_s22 }
  0x2f   : > { %s176_s3 = scalar_lea.vmem (!%p615_p6), [#allocation3], %s342_s23 }
  0x32   : > { %488 = dma.done.wait (%p579_p7), %s173_s24, 128  }
  0x33   : > { %490 = vsyncadd (%p579_p7), %s173_s24, 4294967168  ;;  %s182_s4 = scalar_lea.sflag [#allocation6], %s172_s22  ;;  %s185_s5 = scalar_lea.vmem [#allocation5], %s342_s23 }
  0x34   : > { %492 = dma.done.wait (%p579_p7), %s182_s4, 128  }
  0x35   : > { %494 = vsyncadd (%p579_p7), %s182_s4, 4294967168  ;;  %v219_v0 = vld [vmem:[%s176_s3] sm:$0xff]  ;;  %v220_v1 = vld [vmem:[%s185_s5] sm:$0xff]  ;;  %p210_p9 = scmp.lt.s32.totalorder %s509_s12, 1  ;;  %vm233_vm0 = vcmask 7168  }
  0x36   : > { %v221_v2 = vsub.f32 %v219_v0, %v220_v1 }
  0x37   : > { %s677_s12 = smov (!%p210_p9, %s509_s12), 1 }
  0x38   : > { %v222_v3 = vmul.f32 %v221_v2, %v221_v2  ;;  %s344_s30 = sshll.u32 %s677_s12, 3 }
  0x39   : > { %s213_s8 = scalar_lea.vmem %s664_s2, %s344_s30 }
  0x3a   : > { %231 = vadd.xlane.f32.xlu0 %v222_v3 }
  0xc3   : > { %v232_v4 = vpop.xlane.xlu0 %231 }
  0xc4   : > { %234 = vst.msk [vmem:[%s213_s8] sm:$0xff] %vm233_vm0, %v232_v4 }
  0xc5 PF: > { %s18_s14 = sadd.s32 1, %s517_s14   ;;  %s669_s9 = smov %s501_s10 }
  0xc6   : > { %p15_p7 = scmp.ge.s32.totalorder %s18_s14, 4   ;;  %s670_s10 = smov %s505_s11 }
  0xc7   : > { %s671_s11 = smov %s585_s21  ;;  %s672_s12 = smov %s513_s13 }
  0xc8   : > { %s673_s13 = smov %s675_s16  ;;  %17 = sbr.rel (!%p15_p7) target bundleno = 6 (0x6), region = 89 }
  0xcd   :  { %254 = vsyncpa [#allocation4], 1 }
  0xce   :  { %256 = vsyncpa [#allocation4 + $0x1], 1 }
  0xcf   :  { %257 = vsyncpa [#allocation6], 1 }
  0xd0   :  { %259 = vsyncpa [#allocation6 + $0x1], 1 }

</bundles_post_ra>
